<compile_context>
chip_gen: v7x
topology: tpu7x:2x2x1
jax: 0.10.0
libtpu: 0.0.40
codegen_flags: <defaults>
</compile_context>

<pallas_src>
import jax
import jax.numpy as jnp
from jax.experimental import pallas as pl
from jax.experimental.pallas import tpu as pltpu


def clam_kernel(y_ref, w1t_ref, b1_ref, w2t_ref, b2_ref, o_ref):
    y = y_ref[...]                                       # (TB, C, L), native dtype
    L = y.shape[-1]

    # AdaptiveAvgPool1d(1): mean over the length dim, accumulated in f32
    # (no full-tile f32 materialization of Y).
    pool = jnp.sum(y, axis=-1, dtype=jnp.float32) * (1.0 / L)        # (TB, C)

    # Conv1d(C -> C//2, kernel=1)  ==  pool @ W1^T + b1
    h = jnp.dot(pool, w1t_ref[...],
                preferred_element_type=jnp.float32) + b1_ref[...]    # (TB, C//2)

    # LeakyReLU (PyTorch default negative_slope = 0.01)
    h = jnp.where(h > 0, h, 0.01 * h)

    # Conv1d(C//2 -> C, kernel=1) + Sigmoid
    a = jax.nn.sigmoid(
        jnp.dot(h, w2t_ref[...],
                preferred_element_type=jnp.float32) + b2_ref[...])   # (TB, C)

    # Hoist (+1) and the cast to the output dtype BEFORE broadcasting over L.
    scale = (a + 1.0).astype(o_ref.dtype)                            # (TB, C)

    # out = atten * Y + Y = Y * (atten + 1), done in the native dtype so the
    # dominant elementwise pass is bf16-wide on v6e/v7x and single-pass on v5e.
    o_ref[...] = y * scale[:, :, None]


def clam_forward(y, w1, b1, w2, b2, *, tb=None, vmem_limit_bytes=None):
    """y: (B, C, L); w1: (C//2, C); b1: (C//2,); w2: (C, C//2); b2: (C,)."""
    B, C, L = y.shape
    Ch = C // 2
    itemsize = jnp.dtype(y.dtype).itemsize

    if tb is None:
        # Target ~4 MiB per Y block: large enough to amortize the ~0.35 us
        # per-grid-step overhead and reach ~85%+ of HBM roofline, while the
        # per-step VMEM footprint (2 in + 2 out double-buffered blocks plus
        # resident weights) stays well under v7x's 64 MiB physical VMEM.
        target_block_bytes = 4 << 20
        tb = max(1, min(B, target_block_bytes // max(1, C * L * itemsize)))
        while B % tb != 0:          # keep the grid exact
            tb -= 1
    assert B % tb == 0, "tb must divide B"

    block_bytes = tb * C * L * itemsize
    if vmem_limit_bytes is None:
        # ~2x(in) + ~2x(out) buffers + weights + slack; cap below v7x physical.
        vmem_limit_bytes = int(min(48 << 20, max(16 << 20, 6 * block_bytes)))

    w1t = jnp.transpose(w1)          # (C, C//2)
    w2t = jnp.transpose(w2)          # (C//2, C)
    b1r = b1.reshape(1, Ch)
    b2r = b2.reshape(1, C)

    # Streaming-bound op: ~1 read + 1 write of Y, negligible FLOPs.
    cost = pl.CostEstimate(
        flops=2 * B * C * L + 2 * (2 * B * C * Ch),
        transcendentals=B * C,
        bytes_accessed=2 * B * C * L * itemsize,
    )

    return pl.pallas_call(
        clam_kernel,
        out_shape=jax.ShapeDtypeStruct((B, C, L), y.dtype),
        grid=(B // tb,),
        in_specs=[
            pl.BlockSpec((tb, C, L), lambda i: (i, 0, 0)),   # Y tile (block over batch)
            pl.BlockSpec((C, Ch),    lambda i: (0, 0)),      # W1^T (resident)
            pl.BlockSpec((1, Ch),    lambda i: (0, 0)),      # b1
            pl.BlockSpec((Ch, C),    lambda i: (0, 0)),      # W2^T
            pl.BlockSpec((1, C),     lambda i: (0, 0)),      # b2
        ],
        out_specs=pl.BlockSpec((tb, C, L), lambda i: (i, 0, 0)),
        compiler_params=pltpu.CompilerParams(
            dimension_semantics=("parallel",),
            vmem_limit_bytes=vmem_limit_bytes),
        cost_estimate=cost,
    )(y, w1t, b1r, w2t, b2r)


def clam_reference(y, w1, b1, w2, b2):
    pool = jnp.mean(y, axis=-1)                            # (B, C)
    h = pool @ w1.T + b1
    h = jnp.where(h > 0, h, 0.01 * h)
    a = jax.nn.sigmoid(h @ w2.T + b2)                      # (B, C)
    return y * a[:, :, None] + y


if __name__ == "__main__":
    key = jax.random.PRNGKey(0)
    B, C, L = 4, 32, 128            # small shapes; C must be even (C//2 hidden)
    Ch = C // 2
    k0, k1, k2, k3, k4 = jax.random.split(key, 5)

    y = jax.random.normal(k0, (B, C, L), jnp.float32)

    # Deterministic parameter init (PyTorch-style uniform bounds 1/sqrt(fan_in)).
    s1 = 1.0 / (C ** 0.5)
    w1 = jax.random.uniform(k1, (Ch, C), jnp.float32, -s1, s1)   # Conv1d(C -> C//2, k=1)
    b1 = jax.random.uniform(k2, (Ch,),   jnp.float32, -s1, s1)
    s2 = 1.0 / (Ch ** 0.5)
    w2 = jax.random.uniform(k3, (C, Ch), jnp.float32, -s2, s2)   # Conv1d(C//2 -> C, k=1)
    b2 = jax.random.uniform(k4, (C,),    jnp.float32, -s2, s2)

    out = clam_forward(y, w1, b1, w2, b2)
    out = jax.block_until_ready(out)

    ref = clam_reference(y, w1, b1, w2, b2)
    assert out.shape == (B, C, L)
    assert jnp.allclose(out, ref, atol=1e-5, rtol=1e-5), "mismatch vs reference"
    print("KERNEL_OK")
</pallas_src>

<mosaic_0001>
module attributes {stable_mosaic.version = 11 : i64} {
  func.func @clam_kernel(%arg0: i32, %arg1: memref<4x32x128xf32, #tpu.memory_space<vmem>>, %arg2: memref<32x16xf32, #tpu.memory_space<vmem>>, %arg3: memref<1x16xf32, #tpu.memory_space<vmem>>, %arg4: memref<16x32xf32, #tpu.memory_space<vmem>>, %arg5: memref<1x32xf32, #tpu.memory_space<vmem>>, %arg6: memref<4x32x128xf32, #tpu.memory_space<vmem>>) attributes {dimension_semantics = [#tpu.dimension_semantics<parallel>], iteration_bounds = array<i64: 1>, scalar_prefetch = 0 : i64, scratch_operands = 0 : i64, tpu.core_type = #tpu.core_type<tc>, window_params = [{transform_indices = @transform_0, window_bounds = array<i64: 4, 32, 128>}, {pipeline_mode = #tpu.pipeline_mode<synchronous>, transform_indices = @transform_1, window_bounds = array<i64: 32, 16>}, {pipeline_mode = #tpu.pipeline_mode<synchronous>, transform_indices = @transform_2, window_bounds = array<i64: 1, 16>}, {pipeline_mode = #tpu.pipeline_mode<synchronous>, transform_indices = @transform_3, window_bounds = array<i64: 16, 32>}, {pipeline_mode = #tpu.pipeline_mode<synchronous>, transform_indices = @transform_4, window_bounds = array<i64: 1, 32>}, {transform_indices = @transform_5, window_bounds = array<i64: 4, 32, 128>}]} {
    %c0 = arith.constant 0 : index
    %c0_0 = arith.constant 0 : index
    %c0_1 = arith.constant 0 : index
    %0 = vector.load %arg1[%c0, %c0_0, %c0_1] : memref<4x32x128xf32, #tpu.memory_space<vmem>>, vector<4x32x128xf32>
    %cst = arith.constant dense<0.000000e+00> : vector<4x32xf32>
    %1 = vector.multi_reduction <add>, %0, %cst [2] : vector<4x32x128xf32> to vector<4x32xf32>
    %cst_2 = arith.constant 7.812500e-03 : f32
    %2 = vector.broadcast %cst_2 : f32 to vector<4x32xf32>
    %3 = arith.mulf %1, %2 : vector<4x32xf32>
    %c0_3 = arith.constant 0 : index
    %c0_4 = arith.constant 0 : index
    %4 = vector.load %arg2[%c0_3, %c0_4] : memref<32x16xf32, #tpu.memory_space<vmem>>, vector<32x16xf32>
    %cst_5 = arith.constant dense<0.000000e+00> : vector<4x16xf32>
    %5 = tpu.matmul %3, %4, %cst_5 {dimension_numbers = #tpu.dot_dimension_numbers<[1], [0], [0], [1], [0, 0, 1, 1], [], []>} : vector<4x32xf32>, vector<32x16xf32>, vector<4x16xf32> -> vector<4x16xf32>
    %c0_6 = arith.constant 0 : index
    %c0_7 = arith.constant 0 : index
    %6 = vector.load %arg3[%c0_6, %c0_7] : memref<1x16xf32, #tpu.memory_space<vmem>>, vector<1x16xf32>
    %7 = vector.broadcast %6 : vector<1x16xf32> to vector<4x16xf32>
    %8 = arith.addf %5, %7 : vector<4x16xf32>
    %cst_8 = arith.constant 0.000000e+00 : f32
    %9 = vector.broadcast %cst_8 : f32 to vector<4x16xf32>
    %10 = arith.cmpf ogt, %8, %9 : vector<4x16xf32>
    %cst_9 = arith.constant 0.00999999977 : f32
    %11 = vector.broadcast %cst_9 : f32 to vector<4x16xf32>
    %12 = arith.mulf %11, %8 : vector<4x16xf32>
    %13 = arith.select %10, %8, %12 : vector<4x16xi1>, vector<4x16xf32>
    %c0_10 = arith.constant 0 : index
    %c0_11 = arith.constant 0 : index
    %14 = vector.load %arg4[%c0_10, %c0_11] : memref<16x32xf32, #tpu.memory_space<vmem>>, vector<16x32xf32>
    %cst_12 = arith.constant dense<0.000000e+00> : vector<4x32xf32>
    %15 = tpu.matmul %13, %14, %cst_12 {dimension_numbers = #tpu.dot_dimension_numbers<[1], [0], [0], [1], [0, 0, 1, 1], [], []>} : vector<4x16xf32>, vector<16x32xf32>, vector<4x32xf32> -> vector<4x32xf32>
    %c0_13 = arith.constant 0 : index
    %c0_14 = arith.constant 0 : index
    %16 = vector.load %arg5[%c0_13, %c0_14] : memref<1x32xf32, #tpu.memory_space<vmem>>, vector<1x32xf32>
    %17 = vector.broadcast %16 : vector<1x32xf32> to vector<4x32xf32>
    %18 = arith.addf %15, %17 : vector<4x32xf32>
    %19 = arith.negf %18 : vector<4x32xf32>
    %20 = math.exp %19 : vector<4x32xf32>
    %cst_15 = arith.constant 1.000000e+00 : f32
    %21 = vector.broadcast %cst_15 : f32 to vector<4x32xf32>
    %22 = arith.addf %21, %20 : vector<4x32xf32>
    %23 = arith.divf %21, %22 : vector<4x32xf32>
    %cst_16 = arith.constant 1.000000e+00 : f32
    %24 = vector.broadcast %cst_16 : f32 to vector<4x32xf32>
    %25 = arith.addf %23, %24 : vector<4x32xf32>
    %26 = vector.shape_cast %25 : vector<4x32xf32> to vector<4x32x1xf32>
    %27 = vector.broadcast %26 : vector<4x32x1xf32> to vector<4x32x128xf32>
    %28 = arith.mulf %0, %27 : vector<4x32x128xf32>
    %c0_17 = arith.constant 0 : index
    %c0_18 = arith.constant 0 : index
    %c0_19 = arith.constant 0 : index
    %29 = vector.load %arg6[%c0_17, %c0_18, %c0_19] : memref<4x32x128xf32, #tpu.memory_space<vmem>>, vector<4x32x128xf32>
    tpu.vector_store %arg6[%c0_17, %c0_18, %c0_19], %28 {strides = array<i32>} : memref<4x32x128xf32, #tpu.memory_space<vmem>>, vector<4x32x128xf32>,
    return
  }
  func.func @transform_0(%arg0: i32) -> (i32, i32, i32) {
    %c0_i32 = arith.constant 0 : i32
    %c0_i32_0 = arith.constant 0 : i32
    %c0_i32_1 = arith.constant 0 : i32
    return %arg0, %c0_i32, %c0_i32_0 : i32, i32, i32
  }
  func.func @transform_1(%arg0: i32) -> (i32, i32) {
    %c0_i32 = arith.constant 0 : i32
    %c0_i32_0 = arith.constant 0 : i32
    %c0_i32_1 = arith.constant 0 : i32
    return %c0_i32, %c0_i32_0 : i32, i32
  }
  func.func @transform_2(%arg0: i32) -> (i32, i32) {
    %c0_i32 = arith.constant 0 : i32
    %c0_i32_0 = arith.constant 0 : i32
    %c0_i32_1 = arith.constant 0 : i32
    return %c0_i32, %c0_i32_0 : i32, i32
  }
  func.func @transform_3(%arg0: i32) -> (i32, i32) {
    %c0_i32 = arith.constant 0 : i32
    %c0_i32_0 = arith.constant 0 : i32
    %c0_i32_1 = arith.constant 0 : i32
    return %c0_i32, %c0_i32_0 : i32, i32
  }
  func.func @transform_4(%arg0: i32) -> (i32, i32) {
    %c0_i32 = arith.constant 0 : i32
    %c0_i32_0 = arith.constant 0 : i32
    %c0_i32_1 = arith.constant 0 : i32
    return %c0_i32, %c0_i32_0 : i32, i32
  }
  func.func @transform_5(%arg0: i32) -> (i32, i32, i32) {
    %c0_i32 = arith.constant 0 : i32
    %c0_i32_0 = arith.constant 0 : i32
    %c0_i32_1 = arith.constant 0 : i32
    return %arg0, %c0_i32, %c0_i32_0 : i32, i32, i32
  }
}

</mosaic_0001>

<bundles_post_ra>
// kernel: tpu_custom_call.1
= control target key start
LH: loop header
LB: loop body
LE: loop exit
PB: predicated region body
PF: predicated region fallthrough
CT: control target
= control target key end

     0   :  { %10 = vsyncpa [#allocation3], 0  ;;  %s784_s0 = inlined_call_operand.hbm [shape: f32[4,32,128], index: 0, kind: input, shape index: {}]   ;;  %s785_s1 = inlined_call_operand.vmem [shape: f32[32,16], index: 1, kind: input, shape index: {}]   ;;  %s786_s2 = inlined_call_operand.vmem [shape: f32[1,16], index: 2, kind: input, shape index: {}]   ;;  %s787_s3 = inlined_call_operand.vmem [shape: f32[16,32], index: 3, kind: input, shape index: {}]   ;;  %s788_s4 = inlined_call_operand.vmem [shape: f32[1,32], index: 4, kind: input, shape index: {}]   ;;  %s789_s5 = inlined_call_operand.hbm [shape: f32[4,32,128], index: 5, kind: output, shape index: {}]  }
   0x1   :  { %11 = vsyncpa [#allocation4], 0  ;;  %s606_s18 = smov [#allocation2]   ;;  %s558_s22 = scalar_lea.hbm %s784_s0, 2048 }
   0x2   :  { %s17_s19 = sshll.u32 %s606_s18, 4  ;;  %p559_p0 = scmp.ne.s32.totalorder %s784_s0, %s558_s22  ;;  %s18_s19 = int_to_ptr.vmem [resolvable:$true] %s17_s19 }
   0x3   :  { %p562_p1 = scmp.lt.u32.totalorder %s558_s22, %s784_s0 }
   0x5   :  { %p564_p2 = pnand %p562_p1, %p559_p0 }
   0x7   :  { %567 = shalt.err (!%p564_p2)
}
   0x8   :  { %s568_s27 = scalar_lea.vmem %s18_s19, 2048  ;;  %p573_p4 = scmp.lt.s32.totalorder %s18_s19, %s18_s19 }
   0x9   :  { %p569_p3 = scmp.ne.s32.totalorder %s18_s19, %s568_s27  ;;  %p574_p5 = scmp.lt.s32.totalorder %s568_s27, %s568_s27 }
   0xb   :  { %p575_p6 = por %p574_p5, %p573_p4 }
   0xd   :  { %p576_p7 = pnand %p575_p6, %p569_p3 }
   0xf   :  { %579 = shalt.err (!%p576_p7)
}
  0x10   :  { %s607_s28 = smov 128   ;;  %s608_s29 = smov 8  }
  0x11   :  { %23 = dma.hbm_to_vmem [thread:$0]  %s784_s0, 2048, %s18_s19, [#allocation3], %s607_s28, %s607_s28, %s608_s29  }
  0x12   :  { %602 = dma.done.wait [#allocation3], 2048  }
  0x13   :  { %603 = vsyncadd [#allocation3], 4294965248  ;;  %v658_v0 = vld [vmem:[#allocation2 + $0x20] sm:$0xff]  ;;  %v664_v2 = vld [vmem:[#allocation2 + $0x28] sm:$0xff]  ;;  %v609_v19 = vmov 0.0|0.0   ;;  %vm610_vm0 = vmmov 0   ;;  %v126_v30 = vlaneseq }
  0x14   :  { %v660_v1 = vld [vmem:[#allocation2] sm:$0xff]  ;;  %59 = vadd.xlane.f32.xlu1 %v658_v0  ;;  %v666_v3 = vld [vmem:[#allocation2 + $0x8] sm:$0xff]  ;;  %v670_v4 = vld [vmem:[#allocation2 + $0x30] sm:$0xff]  ;;  %538 = vmatprep.subr.bf16.mxu0 %v609_v19  ;;  %v611_v23 = vmov 0.0   ;;  %vm137_vm1 = vcmask 130112   ;;  %vm144_vm2 = vcmask 195712  }
  0x15   :  { %51 = vadd.xlane.f32.xlu0 %v660_v1  ;;  %v672_v5 = vld [vmem:[#allocation2 + $0x10] sm:$0xff]  ;;  %v676_v6 = vld [vmem:[#allocation2 + $0x48] sm:$0xff]  ;;  %v678_v7 = vld [vmem:[#allocation2 + $0x40] sm:$0xff]  ;;  %544 = vmatprep.subr.bf16.mxu1 %v609_v19  ;;  %v127_v33 = vand.u32 127, %v126_v30  ;;  %v718_v34 = vshrl.u32 %v126_v30, 7  ;;  %vm151_vm3 = vcmask 261312  }
  0x16   :  { %v682_v8 = vld [vmem:[#allocation2 + $0x38] sm:$0xff]  ;;  %v688_v10 = vld [vmem:[#allocation2 + $0x60] sm:$0xff]  ;;  %v690_v11 = vld [vmem:[#allocation2 + $0x50] sm:$0xff]  ;;  %528 = vmatprep.mubr.msk.f32.mxu0 %vm610_vm0, %v611_v23  ;;  %535 = vmatprep.mubr.msk.f32.mxu1 %vm610_vm0, %v611_v23  ;;  %vm210_vm4 = vcmask 1041409   ;;  %vm212_vm5 = vcmask 1042434   ;;  %vm214_vm6 = vcmask 1043459  }
  0x17   :  { %v684_v9 = vld [vmem:[#allocation2 + $0x18] sm:$0xff]  ;;  %v696_v13 = vld [vmem:[#allocation2 + $0x68] sm:$0xff]  ;;  %v700_v14 = vld [vmem:[#allocation2 + $0x70] sm:$0xff]  ;;  %v132_v35 = vadd.s32 4294967288, %v127_v33  ;;  %v139_v36 = vadd.s32 4294967280, %v127_v33  ;;  %v130_v39 = vsub.s32 %v127_v33, %v718_v34  ;;  %v146_v40 = vadd.s32 4294967272, %v127_v33 }
  0x18   :  { %61 = vadd.xlane.f32.xlu1 %v664_v2  ;;  %v694_v12 = vld [vmem:[#allocation2 + $0x58] sm:$0xff]  ;;  %v99_v16 = vld [vmem:[%s785_s1] sm:$0xff]  ;;  %v100_v17 = vld [vmem:[%s785_s1 + $0x8] sm:$0xff]  ;;  %vm216_vm7 = vcmask 261120   ;;  %vm301_vm9 = vcmask 130048  }
  0x19   :  { %53 = vadd.xlane.f32.xlu0 %v666_v3  ;;  %v702_v15 = vld [vmem:[#allocation2 + $0x78] sm:$0xff]  ;;  %v539_v18 = vpack.c.bf16 %v100_v17, %v99_v16  ;;  %v101_v20 = vld [vmem:[%s785_s1 + $0x10] sm:$0xff]  ;;  %v135_v42 = vsub.s32 %v132_v35, %v718_v34  ;;  %v142_v44 = vsub.s32 %v139_v36, %v718_v34  ;;  %v149_v53 = vsub.s32 %v146_v40, %v718_v34 }
  0x1a   :  { %v102_v21 = vld [vmem:[%s785_s1 + $0x18] sm:$0xff] }
  0x1b   :  { %540 = vmatpush3.bf16.msra.mxu0 %v539_v18  ;;  %v542_v22 = vpack.c.bf16 %v102_v21, %v101_v20 }
  0x1c   :  { %63 = vadd.xlane.f32.xlu1 %v670_v4  ;;  %541 = vmatprep.subr.bf16.mxu0 %v609_v19 }
  0x1d   :  { %55 = vadd.xlane.f32.xlu0 %v672_v5 }
  0x1f   :  { %543 = vmatpush3.bf16.msra.mxu0 %v542_v22 }
  0x20   :  { %69 = vadd.xlane.f32.xlu1 %v676_v6 }
  0x21   :  { %67 = vadd.xlane.f32.xlu0 %v678_v7 }
  0x24   :  { %65 = vadd.xlane.f32.xlu1 %v682_v8 }
  0x25   :  { %57 = vadd.xlane.f32.xlu0 %v684_v9 }
  0x28   :  { %75 = vadd.xlane.f32.xlu1 %v688_v10 }
  0x29   :  { %71 = vadd.xlane.f32.xlu0 %v690_v11 }
  0x2c   :  { %73 = vadd.xlane.f32.xlu1 %v694_v12 }
  0x2d   :  { %77 = vadd.xlane.f32.xlu0 %v696_v13 }
  0x30   :  { %81 = vadd.xlane.f32.xlu1 %v702_v15 }
  0x31   :  { %79 = vadd.xlane.f32.xlu0 %v700_v14 }
  0xa1   :  { %v60_v24 = vpop.xlane.xlu1 %59 }
  0xa2   :  { %v52_v25 = vpop.xlane.xlu0 %51  ;;  %v87_v41 = vmul.f32 0.0078125, %v60_v24 }
  0xa3   :  { %v83_v45 = vmul.f32 0.0078125, %v52_v25 }
  0xa4   :  { %v156_v57 = vrot.slane %v87_v41, %v130_v39 }
  0xa5   :  { %v62_v26 = vpop.xlane.xlu1 %61  ;;  %v131_v59 = vrot.slane %v83_v45, %v130_v39 }
  0xa6   :  { %v54_v27 = vpop.xlane.xlu0 %53  ;;  %v88_v43 = vmul.f32 0.0078125, %v62_v26 }
  0xa7   :  { %v84_v46 = vmul.f32 0.0078125, %v54_v27 }
  0xa8   :  { %v160_v58 = vrot.slane %v88_v43, %v135_v42 }
  0xa9   :  { %v64_v28 = vpop.xlane.xlu1 %63  ;;  %v136_v60 = vrot.slane %v84_v46, %v135_v42 }
  0xaa   :  { %v56_v29 = vpop.xlane.xlu0 %55  ;;  %v89_v47 = vmul.f32 0.0078125, %v64_v28  ;;  %v161_v25 = vsel %vm137_vm1, %v160_v58, %v156_v57 }
  0xab   :  { %v85_v48 = vmul.f32 0.0078125, %v56_v29  ;;  %v138_v27 = vsel %vm137_vm1, %v136_v60, %v131_v59  ;;  %v509_v59 = vld [vmem:[%s788_s4] ss:$0 sm:$0xff] }
  0xac   :  { %v165_v61 = vrot.slane %v89_v47, %v142_v44 }
  0xad   :  { %v70_v31 = vpop.xlane.xlu1 %69  ;;  %v143_v62 = vrot.slane %v85_v48, %v142_v44 }
  0xae   :  { %v68_v32 = vpop.xlane.xlu0 %67  ;;  %v92_v51 = vmul.f32 0.0078125, %v70_v31  ;;  %v166_v28 = vsel %vm144_vm2, %v165_v61, %v161_v25 }
  0xaf   :  { %v91_v52 = vmul.f32 0.0078125, %v68_v32  ;;  %v145_v32 = vsel %vm144_vm2, %v143_v62, %v138_v27 }
  0xb0   :  { %v179_v17 = vrot.slane %v92_v51, %v135_v42 }
  0xb1   :  { %v66_v37 = vpop.xlane.xlu1 %65  ;;  %v175_v18 = vrot.slane %v91_v52, %v130_v39 }
  0xb2   :  { %v58_v38 = vpop.xlane.xlu0 %57  ;;  %v90_v54 = vmul.f32 0.0078125, %v66_v37 }
  0xb3   :  { %v86_v55 = vmul.f32 0.0078125, %v58_v38  ;;  %v180_v33 = vsel %vm137_vm1, %v179_v17, %v175_v18  ;;  %v384_v18 = vsub.s32 0, %v718_v34 }
  0xb4   :  { %v170_v21 = vrot.slane %v90_v54, %v149_v53 }
  0xb5   :  { %v76_v49 = vpop.xlane.xlu1 %75  ;;  %v150_v22 = vrot.slane %v86_v55, %v149_v53 }
  0xb6   :  { %v72_v50 = vpop.xlane.xlu0 %71  ;;  %v95_v23 = vmul.f32 0.0078125, %v76_v49  ;;  %v171_v37 = vsel %vm151_vm3, %v170_v21, %v166_v28 }
  0xb7   :  { %v93_v56 = vmul.f32 0.0078125, %v72_v50  ;;  %v152_v38 = vsel %vm151_vm3, %v150_v22, %v145_v32  ;;  %v403_v22 = vsub.s32 1, %v718_v34 }
  0xb8   :  { %v194_v40 = vrot.slane %v95_v23, %v130_v39  ;;  %v211_v48 = vsel %vm210_vm4, %v171_v37, %v152_v38  ;;  %v292_v39 = vld [vmem:[%s787_s3] sm:$0xff] }
  0xb9   :  { %v74_v63 = vpop.xlane.xlu1 %73  ;;  %v184_v24 = vrot.slane %v93_v56, %v142_v44 }
  0xba   :  { %v78_v16 = vpop.xlane.xlu0 %77  ;;  %v94_v19 = vmul.f32 0.0078125, %v74_v63 }
  0xbb   :  { %v96_v20 = vmul.f32 0.0078125, %v78_v16  ;;  %v185_v41 = vsel %vm144_vm2, %v184_v24, %v180_v33  ;;  %v422_v24 = vsub.s32 2, %v718_v34 }
  0xbc   :  { %v189_v26 = vrot.slane %v94_v19, %v149_v53 }
  0xbd   :  { %v198_v29 = vrot.slane %v96_v20, %v135_v42  ;;  %v82_v31 = vpop.xlane.xlu1 %81 }
  0xbe   :  { %v80_v30 = vpop.xlane.xlu0 %79  ;;  %v98_v36 = vmul.f32 0.0078125, %v82_v31  ;;  %v190_v43 = vsel %vm151_vm3, %v189_v26, %v185_v41  ;;  %v441_v26 = vsub.s32 3, %v718_v34 }
  0xbf   :  { %v97_v35 = vmul.f32 0.0078125, %v80_v30  ;;  %v199_v46 = vsel %vm137_vm1, %v198_v29, %v194_v40  ;;  %v213_v50 = vsel %vm212_vm5, %v190_v43, %v211_v48 }
  0xc0   :  { %v208_v42 = vrot.slane %v98_v36, %v149_v53  ;;  %v507_v53 = vld [vmem:[%s786_s2] ss:$0 sm:$0xff]  ;;  %s612_s2 = smov [#allocation5]  }
  0xc1   :  { %v203_v45 = vrot.slane %v97_v35, %v142_v44  ;;  %v293_v44 = vld [vmem:[%s787_s3 + $0x8] sm:$0xff]  ;;  %s495_s3 = sshll.u32 %s612_s2, 4  ;;  %s496_s3 = int_to_ptr.vmem [resolvable:$true] %s495_s3 }
  0xc2   :  { %v545_v52 = vpack.c.bf16 %v293_v44, %v292_v39  ;;  %s580_s4 = scalar_lea.vmem %s496_s3, 2048  ;;  %p585_p9 = scmp.lt.s32.totalorder %s496_s3, %s496_s3 }
  0xc3   :  { %v204_v47 = vsel %vm144_vm2, %v203_v45, %v199_v46  ;;  %p581_p8 = scmp.ne.s32.totalorder %s496_s3, %s580_s4  ;;  %p586_p10 = scmp.lt.s32.totalorder %s580_s4, %s580_s4 }
  0xc4   :  { %v209_v49 = vsel %vm151_vm3, %v208_v42, %v204_v47  ;;  %546 = vmatpush3.bf16.msra.mxu1 %v545_v52 }
  0xc5   :  { %v215_v51 = vsel %vm214_vm6, %v209_v49, %v213_v50  ;;  %p587_p11 = por %p586_p10, %p585_p9 }
  0xc6   :  { %529 = vmatmul.mubr.msk.f32.vlgmr.msra.gmra.mrb[0].mxu0 %vm216_vm7, %v215_v51 }
  0xc7   :  { %p588_p12 = pnand %p587_p11, %p581_p8 }
 0x199   :  { %v285_v54 = vpop.f32.mrb[0].mxu0 }
 0x19a   :  { %v286_v55 = vadd.f32 %v507_v53, %v285_v54  ;;  %v530_v56 = vpop.f32.mrb[1].mxu0 }
 0x19c   :  { %vm289_vm8 = vcmp.gt.f32.partialorder %v286_v55, 0.0  ;;  %v290_v57 = vmul.f32 0.01, %v286_v55 }
 0x19e   :  { %v291_v58 = vsel %vm289_vm8, %v286_v55, %v290_v57 }
 0x19f   :  { %536 = vmatmul.mubr.msk.f32.vlgmr.msra.gmra.mrb[0].mxu1 %vm301_vm9, %v291_v58 }
 0x272   :  { %v371_v60 = vpop.f32.mrb[0].mxu1 }
 0x273   :  { %v372_v61 = vadd.f32 %v509_v59, %v371_v60  ;;  %v537_v62 = vpop.f32.mrb[1].mxu1 }
 0x275   :  { %v511_v63 = vmul.f32 -1.442695, %v372_v61 }
 0x277   :  { %554 = vpow2.f32 %v511_v63 }
 0x281   :  { %v555_v16 = vpop.eup %554 }
 0x282   :  { %v378_v17 = vadd.f32 1.0, %v555_v16 }
 0x284   :  { %556 = vrcp.f32 %v378_v17 }
 0x28e   :  { %v557_v19 = vpop.eup %556 }
 0x28f   :  { %v381_v20 = vadd.f32 1.0, %v557_v19 }
 0x291   :  { %v385_v21 = vrot.slane %v381_v20, %v384_v18  ;;  %v404_v23 = vrot.slane %v381_v20, %v403_v22  ;;  %v423_v25 = vrot.slane %v381_v20, %v422_v24  ;;  %v442_v27 = vrot.slane %v381_v20, %v441_v26 }
 0x293   :  { %391 = vbcast.lane.b32.xlu1 %v385_v21, 264  ;;  %387 = vbcast.lane.b32.xlu0 %v385_v21, 256 }
 0x297   :  { %395 = vbcast.lane.b32.xlu1 %v385_v21, 272  ;;  %406 = vbcast.lane.b32.xlu0 %v404_v23, 256 }
 0x29b   :  { %399 = vbcast.lane.b32.xlu1 %v385_v21, 280  ;;  %414 = vbcast.lane.b32.xlu0 %v404_v23, 272 }
 0x29f   :  { %410 = vbcast.lane.b32.xlu1 %v404_v23, 264  ;;  %425 = vbcast.lane.b32.xlu0 %v423_v25, 256 }
 0x2a3   :  { %418 = vbcast.lane.b32.xlu1 %v404_v23, 280  ;;  %433 = vbcast.lane.b32.xlu0 %v423_v25, 272 }
 0x2a7   :  { %429 = vbcast.lane.b32.xlu1 %v423_v25, 264  ;;  %444 = vbcast.lane.b32.xlu0 %v442_v27, 256 }
 0x2ab   :  { %437 = vbcast.lane.b32.xlu1 %v423_v25, 280  ;;  %452 = vbcast.lane.b32.xlu0 %v442_v27, 272 }
 0x2af   :  { %448 = vbcast.lane.b32.xlu1 %v442_v27, 264 }
 0x2b3   :  { %456 = vbcast.lane.b32.xlu1 %v442_v27, 280 }
 0x305   :  { %v392_v28 = vpop.permute.xlu1 %391  ;;  %v388_v29 = vpop.permute.xlu0 %387 }
 0x306   :  { %v459_v30 = vmul.f32 %v392_v28, %v666_v3  ;;  %v458_v31 = vmul.f32 %v388_v29, %v660_v1 }
 0x308   :  { %475 = vst [vmem:[#allocation5 + $0x8] sm:$0xff] %v459_v30  ;;  %474 = vst [vmem:[#allocation5] sm:$0xff] %v458_v31 }
 0x309   :  { %v396_v32 = vpop.permute.xlu1 %395  ;;  %v407_v33 = vpop.permute.xlu0 %406 }
 0x30a   :  { %v460_v34 = vmul.f32 %v396_v32, %v672_v5  ;;  %v462_v35 = vmul.f32 %v407_v33, %v658_v0 }
 0x30c   :  { %476 = vst [vmem:[#allocation5 + $0x10] sm:$0xff] %v460_v34  ;;  %478 = vst [vmem:[#allocation5 + $0x20] sm:$0xff] %v462_v35 }
 0x30d   :  { %v400_v36 = vpop.permute.xlu1 %399  ;;  %v415_v37 = vpop.permute.xlu0 %414 }
 0x30e   :  { %v461_v38 = vmul.f32 %v400_v36, %v684_v9  ;;  %v464_v40 = vmul.f32 %v415_v37, %v670_v4 }
 0x310   :  { %477 = vst [vmem:[#allocation5 + $0x18] sm:$0xff] %v461_v38  ;;  %480 = vst [vmem:[#allocation5 + $0x30] sm:$0xff] %v464_v40 }
 0x311   :  { %v411_v3 = vpop.permute.xlu1 %410  ;;  %v426_v1 = vpop.permute.xlu0 %425 }
 0x312   :  { %v463_v41 = vmul.f32 %v411_v3, %v664_v2  ;;  %v466_v43 = vmul.f32 %v426_v1, %v678_v7 }
 0x314   :  { %479 = vst [vmem:[#allocation5 + $0x28] sm:$0xff] %v463_v41  ;;  %482 = vst [vmem:[#allocation5 + $0x40] sm:$0xff] %v466_v43 }
 0x315   :  { %v419_v5 = vpop.permute.xlu1 %418  ;;  %v434_v0 = vpop.permute.xlu0 %433 }
 0x316   :  { %v465_v45 = vmul.f32 %v419_v5, %v682_v8  ;;  %v468_v42 = vmul.f32 %v434_v0, %v690_v11 }
 0x318   :  { %481 = vst [vmem:[#allocation5 + $0x38] sm:$0xff] %v465_v45  ;;  %484 = vst [vmem:[#allocation5 + $0x50] sm:$0xff] %v468_v42 }
 0x319   :  { %v430_v9 = vpop.permute.xlu1 %429  ;;  %v445_v4 = vpop.permute.xlu0 %444 }
 0x31a   :  { %v467_v46 = vmul.f32 %v430_v9, %v676_v6  ;;  %v470_v47 = vmul.f32 %v445_v4, %v688_v10 }
 0x31c   :  { %483 = vst [vmem:[#allocation5 + $0x48] sm:$0xff] %v467_v46  ;;  %486 = vst [vmem:[#allocation5 + $0x60] sm:$0xff] %v470_v47 }
 0x31d   :  { %v438_v2 = vpop.permute.xlu1 %437  ;;  %v453_v7 = vpop.permute.xlu0 %452 }
 0x31e   :  { %v469_v48 = vmul.f32 %v438_v2, %v694_v12  ;;  %v472_v49 = vmul.f32 %v453_v7, %v700_v14 }
 0x320   :  { %485 = vst [vmem:[#allocation5 + $0x58] sm:$0xff] %v469_v48  ;;  %488 = vst [vmem:[#allocation5 + $0x70] sm:$0xff] %v472_v49 }
 0x321   :  { %v449_v8 = vpop.permute.xlu1 %448 }
 0x322   :  { %v471_v11 = vmul.f32 %v449_v8, %v696_v13 }
 0x324   :  { %487 = vst [vmem:[#allocation5 + $0x68] sm:$0xff] %v471_v11 }
 0x325   :  { %v457_v50 = vpop.permute.xlu1 %456 }
 0x326   :  { %v473_v6 = vmul.f32 %v457_v50, %v702_v15 }
 0x328   :  { %489 = vst [vmem:[#allocation5 + $0x78] sm:$0xff] %v473_v6 }
 0x329   :  { %591 = shalt.err (!%p588_p12)
}
 0x32a   :  { %s592_s23 = scalar_lea.hbm %s789_s5, 2048 }
 0x32b   :  { %p593_p13 = scmp.ne.s32.totalorder %s789_s5, %s592_s23  ;;  %p596_p0 = scmp.lt.u32.totalorder %s592_s23, %s789_s5 }
 0x32d   :  { %p598_p1 = pnand %p596_p0, %p593_p13 }
 0x32f   :  { %601 = shalt.err (!%p598_p1)
}
 0x330   :  { %501 = dma.vmem_to_hbm [thread:$0]  %s496_s3, 2048, %s789_s5, [#allocation4], %s607_s28, %s607_s28, %s608_s29  }
 0x331   :  { %604 = dma.done.wait [#allocation4], 2048  }
 0x332   :  { %605 = vsyncadd [#allocation4], 4294965248 }
 0x333   :  { %505 = vsyncpa [#allocation3], 1 }
 0x334   :  { %506 = vsyncpa [#allocation4], 1 }

</bundles_post_ra>
